<compile_context>
chip_gen: v6e
topology: v6e:2x2x1
jax: 0.10.0
libtpu: 0.0.40
codegen_flags: <defaults>
</compile_context>

<pallas_src>
import jax
import jax.numpy as jnp
from jax.experimental import pallas as pl
from jax.experimental.pallas import tpu as pltpu

_LANE = 128
_MIN_BLOCK_BYTES = 2 * 1024 * 1024   # never shrink blocks below ~2 MiB
_MIN_GRID_STEPS = 8                  # target steps on big tensors (megacore / pipeline)


def _sublane_multiple(dtype) -> int:
    # dtype-aware minimum sublane tiling: f32 -> 8, bf16 -> 16, int8/fp8 -> 32
    itemsize = jnp.dtype(dtype).itemsize
    return max(8, 32 // max(1, itemsize))


def _device_tuning():
    """Per-generation (block_bytes, vmem_limit_bytes) for this memory-bound op.

    Bigger blocks amortize the ~0.35 us per-grid-step overhead against HBM
    bandwidth; the explicit VMEM limit keeps double-buffered in+out blocks
    (4 x block_bytes) comfortably inside scoped VMEM on every generation.
    """
    kind = ""
    try:
        kind = jax.devices()[0].device_kind.lower()
    except Exception:
        pass
    if "v7" in kind:
        block, limit = 8 << 20, 48 << 20   # 4x8=32 MiB << 64 MiB physical
    elif "v6" in kind:
        block, limit = 6 << 20, 32 << 20   # 4x6=24 MiB
    elif "v5" in kind:
        block, limit = 3 << 20, 24 << 20   # stay clear of v5e's small default budget
    else:
        block, limit = 2 << 20, None       # conservative for older/unknown parts
    try:  # cap by physical VMEM if the trace-time query is available
        vmem_cap = getattr(pltpu.get_tpu_info(), "vmem_capacity_bytes", None)
        if vmem_cap and limit is not None:
            limit = min(limit, int(vmem_cap * 3 // 4))
    except Exception:
        pass
    return block, limit


def _lrelu_kernel(slope_ref, x_ref, o_ref):
    # slope_ref: (1,) float32 scalar in SMEM -> one compiled kernel for any slope.
    x = x_ref[...]
    s = slope_ref[0]
    o_ref[...] = jnp.where(x >= 0, x, x * s).astype(o_ref.dtype)


def _choose_layout(n: int, dtype, block_bytes: int):
    """Return (cols, rows, tile_rows) for a lane-dense 2D slab, or None."""
    sub = _sublane_multiple(dtype)
    itemsize = jnp.dtype(dtype).itemsize

    # Relaxed exact-fit search: ANY multiple-of-128 divisor of n works (no
    # rows % sub requirement -- the last partial row-block is masked by Pallas
    # because tile_rows stays a multiple of the dtype sublane minimum).
    divisors = [c for c in range(4096, 0, -_LANE) if n % c == 0]
    if not divisors:
        return None
    cols = next((c for c in divisors if n // c >= sub), divisors[0])
    rows = n // cols

    if rows <= sub:
        # Tiny tensor: one short full-dim block.
        return cols, rows, rows

    def _round_sub(r):
        return max(sub, (r // sub) * sub)

    # Byte-budgeted row tile (per-generation block_bytes), sublane aligned.
    tile_rows = _round_sub(min(rows, max(1, block_bytes // (cols * itemsize))))
    # Keep >= ~_MIN_GRID_STEPS steps on big tensors (2-TC sharding / DMA
    # overlap) without dropping below ~_MIN_BLOCK_BYTES per block.
    floor_rows = _round_sub(max(1, _MIN_BLOCK_BYTES // (cols * itemsize)))
    steps_cap = max(floor_rows, _round_sub(rows // _MIN_GRID_STEPS))
    tile_rows = min(tile_rows, steps_cap)
    return cols, rows, tile_rows


def _lrelu_2d(x2d: jax.Array, slope: jax.Array, tile_rows: int, vmem_limit) -> jax.Array:
    rows, cols = x2d.shape
    itemsize = jnp.dtype(x2d.dtype).itemsize
    grid = (pl.cdiv(rows, tile_rows),)
    return pl.pallas_call(
        _lrelu_kernel,
        out_shape=jax.ShapeDtypeStruct((rows, cols), x2d.dtype),
        grid_spec=pltpu.PrefetchScalarGridSpec(
            num_scalar_prefetch=0,
            grid=grid,
            in_specs=[
                pl.BlockSpec(memory_space=pltpu.MemorySpace.SMEM),   # slope scalar
                pl.BlockSpec((tile_rows, cols), lambda i: (i, 0)),
            ],
            out_specs=pl.BlockSpec((tile_rows, cols), lambda i: (i, 0)),
        ),
        compiler_params=pltpu.CompilerParams(
            dimension_semantics=("parallel",),
            vmem_limit_bytes=vmem_limit,
        ),
        cost_estimate=pl.CostEstimate(
            flops=rows * cols,
            transcendentals=0,
            bytes_accessed=2 * rows * cols * itemsize,
        ),
    )(slope, x2d)


def lrelu_inv_forward(x: jax.Array, negative_slope: float = 0.2) -> jax.Array:
    """Forward pass of LReLUInv: leaky_relu(x, negative_slope). Any shape."""
    orig_shape = x.shape
    n = x.size
    block_bytes, vmem_limit = _device_tuning()
    slope = jnp.asarray([negative_slope], dtype=jnp.float32)

    flat = x.reshape(-1)
    layout = _choose_layout(n, x.dtype, block_bytes)
    if layout is not None:
        cols, rows, tile_rows = layout
        y2d = _lrelu_2d(flat.reshape(rows, cols), slope, tile_rows, vmem_limit)
        return y2d.reshape(orig_shape)

    # Ragged fallback: no multiple-of-128 width divides n.  Run the kernel on
    # the lane-aligned prefix and handle the (<128-element) tail with plain
    # jnp, instead of jnp.pad + output slice which doubles HBM traffic.
    neg = jnp.asarray(negative_slope, dtype=x.dtype)
    n_main = (n // _LANE) * _LANE
    if n_main == 0:
        y = jnp.where(flat >= 0, flat, flat * neg)
        return y.reshape(orig_shape)
    cols, rows, tile_rows = _choose_layout(n_main, x.dtype, block_bytes)
    y_main = _lrelu_2d(flat[:n_main].reshape(rows, cols), slope, tile_rows,
                       vmem_limit).reshape(-1)
    tail = flat[n_main:]
    y_tail = jnp.where(tail >= 0, tail, tail * neg)
    return jnp.concatenate([y_main, y_tail]).reshape(orig_shape)


def lrelu_inv_inverse(y: jax.Array, negative_slope: float = 0.2) -> jax.Array:
    """LReLUInv.inverse: leaky_relu with slope 1/negative_slope."""
    assert negative_slope != 0.0, "negative_slope must be nonzero for invertibility"
    return lrelu_inv_forward(y, 1.0 / negative_slope)


if __name__ == "__main__":
    key = jax.random.PRNGKey(0)
    # NCHW input, consistent with how Invertable modules wrap conv activations.
    x = jax.random.normal(key, (2, 4, 16, 16), dtype=jnp.float32)
    negative_slope = 0.2  # module default is None; fixed deterministically here

    y = lrelu_inv_forward(x, negative_slope)
    jax.block_until_ready(y)

    # Reference check in plain JAX.
    y_ref = jnp.where(x >= 0, x, x * negative_slope)
    assert y.shape == x.shape and y.dtype == x.dtype
    assert jnp.allclose(y, y_ref, atol=1e-6), "mismatch vs reference leaky_relu"

    # Round-trip check: inverse(forward(x)) == x  (shares the compiled kernel,
    # since the slope is an SMEM scalar operand).
    x_rt = lrelu_inv_inverse(y, negative_slope)
    jax.block_until_ready(x_rt)
    assert jnp.allclose(x_rt, x, atol=1e-5), "inverse round-trip failed"

    # Ragged-size check (element count not a multiple of 128): prefix kernel +
    # tiny jnp tail, no full-tensor pad/slice.
    x2 = jax.random.normal(jax.random.PRNGKey(1), (2, 3, 7, 11), dtype=jnp.float32)
    y2 = lrelu_inv_forward(x2, negative_slope)
    jax.block_until_ready(y2)
    y2_ref = jnp.where(x2 >= 0, x2, x2 * negative_slope)
    assert jnp.allclose(y2, y2_ref, atol=1e-6), "ragged-shape mismatch"

    print("KERNEL_OK")
</pallas_src>

<mosaic_0001>
module attributes {stable_mosaic.version = 11 : i64} {
  func.func @_lrelu_kernel(%arg0: i32, %arg1: memref<1xf32, #tpu.memory_space<smem>>, %arg2: memref<8x256xf32, #tpu.memory_space<vmem>>, %arg3: memref<8x256xf32, #tpu.memory_space<vmem>>) attributes {dimension_semantics = [#tpu.dimension_semantics<parallel>], iteration_bounds = array<i64: 1>, scalar_prefetch = 0 : i64, scratch_operands = 0 : i64, tpu.core_type = #tpu.core_type<tc>, window_params = [{transform_indices = @transform_0, window_bounds = array<i64: 1>}, {transform_indices = @transform_1, window_bounds = array<i64: 8, 256>}, {transform_indices = @transform_2, window_bounds = array<i64: 8, 256>}]} {
    %c0 = arith.constant 0 : index
    %c0_0 = arith.constant 0 : index
    %0 = vector.load %arg2[%c0, %c0_0] : memref<8x256xf32, #tpu.memory_space<vmem>>, vector<8x256xf32>
    %c0_1 = arith.constant 0 : index
    %1 = memref.load %arg1[%c0_1] : memref<1xf32, #tpu.memory_space<smem>>
    %cst = arith.constant 0.000000e+00 : f32
    %2 = vector.broadcast %cst : f32 to vector<8x256xf32>
    %3 = arith.cmpf oge, %0, %2 : vector<8x256xf32>
    %4 = vector.broadcast %1 : f32 to vector<8x256xf32>
    %5 = arith.mulf %0, %4 : vector<8x256xf32>
    %6 = arith.select %3, %0, %5 : vector<8x256xi1>, vector<8x256xf32>
    %c0_2 = arith.constant 0 : index
    %c0_3 = arith.constant 0 : index
    %7 = vector.load %arg3[%c0_2, %c0_3] : memref<8x256xf32, #tpu.memory_space<vmem>>, vector<8x256xf32>
    tpu.vector_store %arg3[%c0_2, %c0_3], %6 {strides = array<i32>} : memref<8x256xf32, #tpu.memory_space<vmem>>, vector<8x256xf32>,
    return
  }
  func.func @transform_0(%arg0: i32) -> i32 {
    %c0_i32 = arith.constant 0 : i32
    %c0_i32_0 = arith.constant 0 : i32
    return %c0_i32 : i32
  }
  func.func @transform_1(%arg0: i32) -> (i32, i32) {
    %c0_i32 = arith.constant 0 : i32
    %c0_i32_0 = arith.constant 0 : i32
    return %arg0, %c0_i32 : i32, i32
  }
  func.func @transform_2(%arg0: i32) -> (i32, i32) {
    %c0_i32 = arith.constant 0 : i32
    %c0_i32_0 = arith.constant 0 : i32
    return %arg0, %c0_i32 : i32, i32
  }
}

</mosaic_0001>

<bundles_post_ra>
// kernel: tpu_custom_call.1
= control target key start
LH: loop header
LB: loop body
LE: loop exit
PB: predicated region body
PF: predicated region fallthrough
CT: control target
= control target key end

     0   :  { %8 = vsyncpa [#allocation4], 0  ;;  %s124_s0 = inlined_call_operand.<no memory space> [shape: f32[1], index: 0, kind: input, shape index: {}]   ;;  %s125_s1 = inlined_call_operand.hbm [shape: f32[8,256], index: 1, kind: input, shape index: {}]   ;;  %s126_s2 = inlined_call_operand.hbm [shape: f32[8,256], index: 2, kind: output, shape index: {}]  }
   0x1   :  { %9 = vsyncpa [#allocation5], 0  ;;  %s98_s9 = smov [#allocation3]  }
   0x2   :  { %s18_s10 = sshll.u32 %s98_s9, 4  ;;  %s19_s10 = int_to_ptr.vmem [resolvable:$true] %s18_s10 }
   0x3   :  { %s62_s11 = scalar_lea.vmem %s19_s10, 256  ;;  %p67_p1 = scmp.lt.s32.totalorder %s19_s10, %s19_s10 }
   0x4   :  { %p63_p0 = scmp.ne.s32.totalorder %s19_s10, %s62_s11  ;;  %p68_p2 = scmp.lt.s32.totalorder %s62_s11, %s62_s11 }
   0x6   :  { %p69_p3 = por %p68_p2, %p67_p1 }
   0x8   :  { %p70_p4 = pnand %p69_p3, %p63_p0 }
   0xa   :  { %73 = shalt.err (!%p70_p4)
}
   0xb   :  { %21 = dma.hbm_to_vmem [thread:$0]  %s125_s1, 256, %s19_s10, [#allocation4]  }
   0xc   :  { %94 = dma.done.wait [#allocation4], 256  }
   0xd   :  { %95 = vsyncadd [#allocation4], 4294967040  ;;  %v30_v0 = vstv %s124_s0  ;;  %s99_s16 = smov [#allocation6]   ;;  %v25_v1 = vld [vmem:[#allocation3] sm:$0xff]  ;;  %v26_v2 = vld [vmem:[#allocation3 + $0x8] sm:$0xff] }
   0xe   :  { %s43_s17 = sshll.u32 %s99_s16, 4  ;;  %vm28_vm0 = vcmp.ge.f32.partialorder %v25_v1, 0.0  ;;  %v31_v3 = vmul.f32 %v30_v0, %v25_v1  ;;  %vm29_vm1 = vcmp.ge.f32.partialorder %v26_v2, 0.0  ;;  %v32_v4 = vmul.f32 %v30_v0, %v26_v2  ;;  %s44_s17 = int_to_ptr.vmem [resolvable:$true] %s43_s17 }
   0xf   :  { %s74_s1 = scalar_lea.vmem %s44_s17, 256  ;;  %p79_p6 = scmp.lt.s32.totalorder %s44_s17, %s44_s17 }
  0x10   :  { %v33_v5 = vsel %vm28_vm0, %v25_v1, %v31_v3  ;;  %v34_v6 = vsel %vm29_vm1, %v26_v2, %v32_v4  ;;  %p75_p5 = scmp.ne.s32.totalorder %s44_s17, %s74_s1  ;;  %p80_p7 = scmp.lt.s32.totalorder %s74_s1, %s74_s1 }
  0x11   :  { %35 = vst [vmem:[#allocation6] sm:$0xff] %v33_v5  ;;  %36 = vst [vmem:[#allocation6 + $0x8] sm:$0xff] %v34_v6 }
  0x12   :  { %p81_p8 = por %p80_p7, %p79_p6 }
  0x14   :  { %p82_p9 = pnand %p81_p8, %p75_p5 }
  0x16   :  { %85 = shalt.err (!%p82_p9)
}
  0x17   :  { %46 = dma.vmem_to_hbm [thread:$0]  %s44_s17, 256, %s126_s2, [#allocation5]  }
  0x18   :  { %96 = dma.done.wait [#allocation5], 256  }
  0x19   :  { %97 = vsyncadd [#allocation5], 4294967040 }
  0x1a   :  { %50 = vsyncpa [#allocation4], 1 }
  0x1b   :  { %51 = vsyncpa [#allocation5], 1 }

</bundles_post_ra>
